<compile_context>
chip_gen: v5e
topology: v5e:2x2
jax: 0.10.0
libtpu: 0.0.40
codegen_flags: <defaults>
</compile_context>

<pallas_src>
import jax
import jax.numpy as jnp
from jax.experimental import pallas as pl
from jax.experimental.pallas import tpu as pltpu


# ----------------------------------------------------------------------------
# Kernel: fused 3-layer MLP over all nets at once.
# ----------------------------------------------------------------------------
def _tqc_kernel(obs_ref, act_ref, w1o_ref, w1a_ref, b1_ref,
                w2_ref, b2_ref, w3_ref, b3_ref, o_ref):
    # Layer 1:  x @ W1  ==  obs @ W1[:obs_dim] + act @ W1[obs_dim:]
    h = jnp.dot(obs_ref[...], w1o_ref[...], preferred_element_type=jnp.float32)
    h = h + jnp.dot(act_ref[...], w1a_ref[...], preferred_element_type=jnp.float32)
    h = jnp.maximum(h + b1_ref[...], 0.0)                       # ReLU
    # Layer 2 (block-diagonal over nets -> per-net Linear)
    h = jnp.dot(h, w2_ref[...], preferred_element_type=jnp.float32) + b2_ref[...]
    h = jnp.maximum(h, 0.0)                                     # ReLU
    # Layer 3 (block-diagonal over nets -> per-net Linear)
    q = jnp.dot(h, w3_ref[...], preferred_element_type=jnp.float32) + b3_ref[...]
    o_ref[...] = q.astype(o_ref.dtype)                          # (B, n_nets*n_q)


# ----------------------------------------------------------------------------
# One-time parameter packing (done outside the per-call path).
# ----------------------------------------------------------------------------
def _block_diag(w):
    """(n, a, b) per-net weights -> (n*a, n*b) block-diagonal matrix."""
    n, a, b = w.shape
    eye = jnp.eye(n, dtype=w.dtype)
    return jnp.einsum('ij,ipq->ipjq', eye, w).reshape(n * a, n * b)


def pack_params(params, obs_dim):
    """Pack per-net params (w1,b1,w2,b2,w3,b3) into fused kernel operands."""
    w1, b1, w2, b2, w3, b3 = params
    n_nets, d_in, h1 = w1.shape
    h2 = w2.shape[-1]
    n_q = w3.shape[-1]

    # W1: (n_nets, d_in, h1) -> (d_in, n_nets*h1), columns grouped per net.
    w1p = jnp.transpose(w1, (1, 0, 2)).reshape(d_in, n_nets * h1)
    w1o = w1p[:obs_dim]          # (obs_dim, n_nets*h1)
    w1a = w1p[obs_dim:]          # (act_dim, n_nets*h1)
    b1p = b1.reshape(1, n_nets * h1)

    w2bd = _block_diag(w2)       # (n_nets*h1, n_nets*h2)
    b2p = b2.reshape(1, n_nets * h2)

    w3bd = _block_diag(w3)       # (n_nets*h2, n_nets*n_q)
    b3p = b3.reshape(1, n_nets * n_q)

    packed = (w1o, w1a, b1p, w2bd, b2p, w3bd, b3p)
    return packed, (n_nets, n_q)


# ----------------------------------------------------------------------------
# Wrapper: single pallas_call, everything resident in VMEM.
# ----------------------------------------------------------------------------
def tqc_critic_forward(obs, action, packed, n_nets, n_q):
    """Pallas implementation of tqc_critic_net.forward(obs, action).

    Returns quantiles of shape (B, n_nets, n_quantiles)."""
    b, obs_dim = obs.shape
    act_dim = action.shape[1]
    w1o, w1a, b1p, w2bd, b2p, w3bd, b3p = packed
    h1w = w1o.shape[1]    # n_nets * h1
    h2w = w2bd.shape[1]   # n_nets * h2
    nqw = w3bd.shape[1]   # n_nets * n_q

    out = pl.pallas_call(
        _tqc_kernel,
        out_shape=jax.ShapeDtypeStruct((b, nqw), jnp.float32),
        grid=(1,),
        in_specs=[
            pl.BlockSpec((b, obs_dim), lambda i: (0, 0)),     # obs
            pl.BlockSpec((b, act_dim), lambda i: (0, 0)),     # action
            pl.BlockSpec((obs_dim, h1w), lambda i: (0, 0)),   # W1 (obs part)
            pl.BlockSpec((act_dim, h1w), lambda i: (0, 0)),   # W1 (action part)
            pl.BlockSpec((1, h1w), lambda i: (0, 0)),         # b1
            pl.BlockSpec((h1w, h2w), lambda i: (0, 0)),       # W2 (block-diag)
            pl.BlockSpec((1, h2w), lambda i: (0, 0)),         # b2
            pl.BlockSpec((h2w, nqw), lambda i: (0, 0)),       # W3 (block-diag)
            pl.BlockSpec((1, nqw), lambda i: (0, 0)),         # b3
        ],
        out_specs=pl.BlockSpec((b, nqw), lambda i: (0, 0)),   # lane-dense slab
    )(obs, action, w1o, w1a, b1p, w2bd, b2p, w3bd, b3p)

    # (B, n_nets*n_q) -> (B, n_nets, n_q)  == torch.stack(..., dim=-2)
    return out.reshape(b, n_nets, n_q)


# ----------------------------------------------------------------------------
# Pure-JAX reference mirroring the PyTorch module semantics.
# ----------------------------------------------------------------------------
def _reference_forward(obs, action, params):
    x = jnp.concatenate([obs, action], axis=-1)
    w1, b1, w2, b2, w3, b3 = params
    outs = []
    for i in range(w1.shape[0]):
        h = jnp.maximum(x @ w1[i] + b1[i], 0.0)
        h = jnp.maximum(h @ w2[i] + b2[i], 0.0)
        outs.append(h @ w3[i] + b3[i])
    return jnp.stack(outs, axis=-2)


def _init_params(key, n_nets, d_in, hidden_sizes, n_quantiles):
    h1, h2 = hidden_sizes
    keys = jax.random.split(key, 6)

    def unif(k, shape, fan_in):
        bound = 1.0 / jnp.sqrt(float(fan_in))
        return jax.random.uniform(k, shape, jnp.float32, -bound, bound)

    w1 = unif(keys[0], (n_nets, d_in, h1), d_in)
    b1 = unif(keys[1], (n_nets, h1), d_in)
    w2 = unif(keys[2], (n_nets, h1, h2), h1)
    b2 = unif(keys[3], (n_nets, h2), h1)
    w3 = unif(keys[4], (n_nets, h2, n_quantiles), h2)
    b3 = unif(keys[5], (n_nets, n_quantiles), h2)
    return (w1, b1, w2, b2, w3, b3)


if __name__ == "__main__":
    # Small cfg: critic_hidden_sizes=[32, 32], n_quantiles=25, n_nets=5.
    B = 2
    OBS_DIM = 24
    ACT_DIM = 8
    HIDDEN = (32, 32)
    N_QUANTILES = 25
    N_NETS = 5

    key = jax.random.PRNGKey(0)
    k_obs, k_act, k_par = jax.random.split(key, 3)
    obs = jax.random.normal(k_obs, (B, OBS_DIM), jnp.float32)
    action = jax.random.normal(k_act, (B, ACT_DIM), jnp.float32)
    params = _init_params(k_par, N_NETS, OBS_DIM + ACT_DIM, HIDDEN, N_QUANTILES)

    # One-time host-side packing of parameters for the fused kernel.
    packed, (n_nets, n_q) = pack_params(params, OBS_DIM)
    packed = jax.block_until_ready(packed)

    quantiles = jax.block_until_ready(
        tqc_critic_forward(obs, action, packed, n_nets, n_q))
    ref = jax.block_until_ready(_reference_forward(obs, action, params))

    assert quantiles.shape == (B, N_NETS, N_QUANTILES), quantiles.shape
    assert jnp.allclose(quantiles, ref, atol=1e-5, rtol=1e-5)
    print("KERNEL_OK")
</pallas_src>

<mosaic_0001>
module attributes {stable_mosaic.version = 11 : i64} {
  func.func @_tqc_kernel(%arg0: i32, %arg1: memref<2x24xf32, #tpu.memory_space<vmem>>, %arg2: memref<2x8xf32, #tpu.memory_space<vmem>>, %arg3: memref<24x160xf32, #tpu.memory_space<vmem>>, %arg4: memref<8x160xf32, #tpu.memory_space<vmem>>, %arg5: memref<1x160xf32, #tpu.memory_space<vmem>>, %arg6: memref<160x160xf32, #tpu.memory_space<vmem>>, %arg7: memref<1x160xf32, #tpu.memory_space<vmem>>, %arg8: memref<160x125xf32, #tpu.memory_space<vmem>>, %arg9: memref<1x125xf32, #tpu.memory_space<vmem>>, %arg10: memref<2x125xf32, #tpu.memory_space<vmem>>) attributes {dimension_semantics = [#tpu.dimension_semantics<arbitrary>], iteration_bounds = array<i64: 1>, scalar_prefetch = 0 : i64, scratch_operands = 0 : i64, tpu.core_type = #tpu.core_type<tc>, window_params = [{pipeline_mode = #tpu.pipeline_mode<synchronous>, transform_indices = @transform_0, window_bounds = array<i64: 2, 24>}, {pipeline_mode = #tpu.pipeline_mode<synchronous>, transform_indices = @transform_1, window_bounds = array<i64: 2, 8>}, {pipeline_mode = #tpu.pipeline_mode<synchronous>, transform_indices = @transform_2, window_bounds = array<i64: 24, 160>}, {pipeline_mode = #tpu.pipeline_mode<synchronous>, transform_indices = @transform_3, window_bounds = array<i64: 8, 160>}, {pipeline_mode = #tpu.pipeline_mode<synchronous>, transform_indices = @transform_4, window_bounds = array<i64: 1, 160>}, {pipeline_mode = #tpu.pipeline_mode<synchronous>, transform_indices = @transform_5, window_bounds = array<i64: 160, 160>}, {pipeline_mode = #tpu.pipeline_mode<synchronous>, transform_indices = @transform_6, window_bounds = array<i64: 1, 160>}, {pipeline_mode = #tpu.pipeline_mode<synchronous>, transform_indices = @transform_7, window_bounds = array<i64: 160, 125>}, {pipeline_mode = #tpu.pipeline_mode<synchronous>, transform_indices = @transform_8, window_bounds = array<i64: 1, 125>}, {pipeline_mode = #tpu.pipeline_mode<synchronous>, transform_indices = @transform_9, window_bounds = array<i64: 2, 125>}]} {
    %c0 = arith.constant 0 : index
    %c0_0 = arith.constant 0 : index
    %0 = vector.load %arg1[%c0, %c0_0] : memref<2x24xf32, #tpu.memory_space<vmem>>, vector<2x24xf32>
    %c0_1 = arith.constant 0 : index
    %c0_2 = arith.constant 0 : index
    %1 = vector.load %arg3[%c0_1, %c0_2] : memref<24x160xf32, #tpu.memory_space<vmem>>, vector<24x160xf32>
    %cst = arith.constant dense<0.000000e+00> : vector<2x160xf32>
    %2 = tpu.matmul %0, %1, %cst {dimension_numbers = #tpu.dot_dimension_numbers<[1], [0], [0], [1], [0, 0, 1, 1], [], []>} : vector<2x24xf32>, vector<24x160xf32>, vector<2x160xf32> -> vector<2x160xf32>
    %c0_3 = arith.constant 0 : index
    %c0_4 = arith.constant 0 : index
    %3 = vector.load %arg2[%c0_3, %c0_4] : memref<2x8xf32, #tpu.memory_space<vmem>>, vector<2x8xf32>
    %c0_5 = arith.constant 0 : index
    %c0_6 = arith.constant 0 : index
    %4 = vector.load %arg4[%c0_5, %c0_6] : memref<8x160xf32, #tpu.memory_space<vmem>>, vector<8x160xf32>
    %cst_7 = arith.constant dense<0.000000e+00> : vector<2x160xf32>
    %5 = tpu.matmul %3, %4, %cst_7 {dimension_numbers = #tpu.dot_dimension_numbers<[1], [0], [0], [1], [0, 0, 1, 1], [], []>} : vector<2x8xf32>, vector<8x160xf32>, vector<2x160xf32> -> vector<2x160xf32>
    %6 = arith.addf %2, %5 : vector<2x160xf32>
    %c0_8 = arith.constant 0 : index
    %c0_9 = arith.constant 0 : index
    %7 = vector.load %arg5[%c0_8, %c0_9] : memref<1x160xf32, #tpu.memory_space<vmem>>, vector<1x160xf32>
    %8 = vector.broadcast %7 : vector<1x160xf32> to vector<2x160xf32>
    %9 = arith.addf %6, %8 : vector<2x160xf32>
    %cst_10 = arith.constant 0.000000e+00 : f32
    %10 = vector.broadcast %cst_10 : f32 to vector<2x160xf32>
    %11 = arith.maximumf %9, %10 : vector<2x160xf32>
    %c0_11 = arith.constant 0 : index
    %c0_12 = arith.constant 0 : index
    %12 = vector.load %arg6[%c0_11, %c0_12] : memref<160x160xf32, #tpu.memory_space<vmem>>, vector<160x160xf32>
    %cst_13 = arith.constant dense<0.000000e+00> : vector<2x160xf32>
    %13 = tpu.matmul %11, %12, %cst_13 {dimension_numbers = #tpu.dot_dimension_numbers<[1], [0], [0], [1], [0, 0, 1, 1], [], []>} : vector<2x160xf32>, vector<160x160xf32>, vector<2x160xf32> -> vector<2x160xf32>
    %c0_14 = arith.constant 0 : index
    %c0_15 = arith.constant 0 : index
    %14 = vector.load %arg7[%c0_14, %c0_15] : memref<1x160xf32, #tpu.memory_space<vmem>>, vector<1x160xf32>
    %15 = vector.broadcast %14 : vector<1x160xf32> to vector<2x160xf32>
    %16 = arith.addf %13, %15 : vector<2x160xf32>
    %cst_16 = arith.constant 0.000000e+00 : f32
    %17 = vector.broadcast %cst_16 : f32 to vector<2x160xf32>
    %18 = arith.maximumf %16, %17 : vector<2x160xf32>
    %c0_17 = arith.constant 0 : index
    %c0_18 = arith.constant 0 : index
    %19 = vector.load %arg8[%c0_17, %c0_18] : memref<160x125xf32, #tpu.memory_space<vmem>>, vector<160x125xf32>
    %cst_19 = arith.constant dense<0.000000e+00> : vector<2x125xf32>
    %20 = tpu.matmul %18, %19, %cst_19 {dimension_numbers = #tpu.dot_dimension_numbers<[1], [0], [0], [1], [0, 0, 1, 1], [], []>} : vector<2x160xf32>, vector<160x125xf32>, vector<2x125xf32> -> vector<2x125xf32>
    %c0_20 = arith.constant 0 : index
    %c0_21 = arith.constant 0 : index
    %21 = vector.load %arg9[%c0_20, %c0_21] : memref<1x125xf32, #tpu.memory_space<vmem>>, vector<1x125xf32>
    %22 = vector.broadcast %21 : vector<1x125xf32> to vector<2x125xf32>
    %23 = arith.addf %20, %22 : vector<2x125xf32>
    %c0_22 = arith.constant 0 : index
    %c0_23 = arith.constant 0 : index
    %24 = vector.load %arg10[%c0_22, %c0_23] : memref<2x125xf32, #tpu.memory_space<vmem>>, vector<2x125xf32>
    tpu.vector_store %arg10[%c0_22, %c0_23], %23 {strides = array<i32>} : memref<2x125xf32, #tpu.memory_space<vmem>>, vector<2x125xf32>,
    return
  }
  func.func @transform_0(%arg0: i32) -> (i32, i32) {
    %c0_i32 = arith.constant 0 : i32
    %c0_i32_0 = arith.constant 0 : i32
    %c0_i32_1 = arith.constant 0 : i32
    return %c0_i32, %c0_i32_0 : i32, i32
  }
  func.func @transform_1(%arg0: i32) -> (i32, i32) {
    %c0_i32 = arith.constant 0 : i32
    %c0_i32_0 = arith.constant 0 : i32
    %c0_i32_1 = arith.constant 0 : i32
    return %c0_i32, %c0_i32_0 : i32, i32
  }
  func.func @transform_2(%arg0: i32) -> (i32, i32) {
    %c0_i32 = arith.constant 0 : i32
    %c0_i32_0 = arith.constant 0 : i32
    %c0_i32_1 = arith.constant 0 : i32
    return %c0_i32, %c0_i32_0 : i32, i32
  }
  func.func @transform_3(%arg0: i32) -> (i32, i32) {
    %c0_i32 = arith.constant 0 : i32
    %c0_i32_0 = arith.constant 0 : i32
    %c0_i32_1 = arith.constant 0 : i32
    return %c0_i32, %c0_i32_0 : i32, i32
  }
  func.func @transform_4(%arg0: i32) -> (i32, i32) {
    %c0_i32 = arith.constant 0 : i32
    %c0_i32_0 = arith.constant 0 : i32
    %c0_i32_1 = arith.constant 0 : i32
    return %c0_i32, %c0_i32_0 : i32, i32
  }
  func.func @transform_5(%arg0: i32) -> (i32, i32) {
    %c0_i32 = arith.constant 0 : i32
    %c0_i32_0 = arith.constant 0 : i32
    %c0_i32_1 = arith.constant 0 : i32
    return %c0_i32, %c0_i32_0 : i32, i32
  }
  func.func @transform_6(%arg0: i32) -> (i32, i32) {
    %c0_i32 = arith.constant 0 : i32
    %c0_i32_0 = arith.constant 0 : i32
    %c0_i32_1 = arith.constant 0 : i32
    return %c0_i32, %c0_i32_0 : i32, i32
  }
  func.func @transform_7(%arg0: i32) -> (i32, i32) {
    %c0_i32 = arith.constant 0 : i32
    %c0_i32_0 = arith.constant 0 : i32
    %c0_i32_1 = arith.constant 0 : i32
    return %c0_i32, %c0_i32_0 : i32, i32
  }
  func.func @transform_8(%arg0: i32) -> (i32, i32) {
    %c0_i32 = arith.constant 0 : i32
    %c0_i32_0 = arith.constant 0 : i32
    %c0_i32_1 = arith.constant 0 : i32
    return %c0_i32, %c0_i32_0 : i32, i32
  }
  func.func @transform_9(%arg0: i32) -> (i32, i32) {
    %c0_i32 = arith.constant 0 : i32
    %c0_i32_0 = arith.constant 0 : i32
    %c0_i32_1 = arith.constant 0 : i32
    return %c0_i32, %c0_i32_0 : i32, i32
  }
}

</mosaic_0001>

<bundles_post_ra>
// kernel: tpu_custom_call.1
= control target key start
LH: loop header
LB: loop body
LE: loop exit
PB: predicated region body
PF: predicated region fallthrough
CT: control target
= control target key end

     0   :  { %14 = vsyncpa [#allocation3], 0  ;;  %s741_s0 = inlined_call_operand.hbm [shape: f32[2,24], index: 0, kind: input, shape index: {}]   ;;  %s742_s1 = inlined_call_operand.hbm [shape: f32[2,8], index: 1, kind: input, shape index: {}]   ;;  %s743_s2 = inlined_call_operand.hbm [shape: f32[24,160], index: 2, kind: input, shape index: {}]   ;;  %s744_s3 = inlined_call_operand.hbm [shape: f32[8,160], index: 3, kind: input, shape index: {}]   ;;  %s745_s4 = inlined_call_operand.vmem [shape: f32[1,160], index: 4, kind: input, shape index: {}]   ;;  %s746_s5 = inlined_call_operand.hbm [shape: f32[160,160], index: 5, kind: input, shape index: {}]   ;;  %s747_s6 = inlined_call_operand.vmem [shape: f32[1,160], index: 6, kind: input, shape index: {}]   ;;  %s748_s7 = inlined_call_operand.hbm [shape: f32[160,125], index: 7, kind: input, shape index: {}]   ;;  %s749_s8 = inlined_call_operand.vmem [shape: f32[1,125], index: 8, kind: input, shape index: {}]   ;;  %s750_s9 = inlined_call_operand.hbm [shape: f32[2,125], index: 9, kind: output, shape index: {}]  }
   0x1   :  { %15 = vsyncpa [#allocation6], 0 }
   0x2   :  { %16 = vsyncpa [#allocation9], 0 }
   0x3   :  { %17 = vsyncpa [#allocation12], 0  ;;  %s35_s11 = sshll.u32 %s742_s1, 4  ;;  %s36_s11 = int_to_ptr.hbm [resolvable:$true] %s35_s11 }
   0x4   :  { %18 = vsyncpa [#allocation4], 0  ;;  %s647_s12 = smov [#allocation5]   ;;  %s59_s16 = sshll.u32 %s744_s3, 4  ;;  %s60_s16 = int_to_ptr.hbm [resolvable:$true] %s59_s16 }
   0x5   :  { %s37_s13 = sshll.u32 %s647_s12, 4  ;;  %s648_s17 = smov [#allocation8]   ;;  %s38_s13 = int_to_ptr.vmem [resolvable:$true] %s37_s13 }
   0x6   :  { %40 = dma.hbm_to_vmem [thread:$0]  %s36_s11, 32, %s38_s13, [#allocation6]  }
   0x7   :  { %s61_s18 = sshll.u32 %s648_s17, 4  ;;  %s24_s21 = sshll.u32 %s741_s0, 4  ;;  %s62_s18 = int_to_ptr.vmem [resolvable:$true] %s61_s18  ;;  %s25_s21 = int_to_ptr.hbm [resolvable:$true] %s24_s21 }
   0x8   :  { %64 = dma.hbm_to_vmem [thread:$0]  %s60_s16, 256, %s62_s18, [#allocation9]  }
   0x9   :  { %s45_s23 = sshll.u32 %s743_s2, 4  ;;  %s649_s24 = smov [#allocation2]   ;;  %s46_s23 = int_to_ptr.hbm [resolvable:$true] %s45_s23 }
   0xa   :  { %s26_s25 = sshll.u32 %s649_s24, 4  ;;  %s650_s3 = smov [#allocation7]   ;;  %s27_s25 = int_to_ptr.vmem [resolvable:$true] %s26_s25 }
   0xb   :  { %29 = dma.hbm_to_vmem [thread:$0]  %s25_s21, 32, %s27_s25, [#allocation3]  }
   0xc   :  { %s47_s26 = sshll.u32 %s650_s3, 4  ;;  %s651_s27 = smov 256   ;;  %s48_s26 = int_to_ptr.vmem [resolvable:$true] %s47_s26 }
   0xd   :  { %s652_s28 = smov 16   ;;  %s71_s30 = sshll.u32 %s746_s5, 4  ;;  %s72_s30 = int_to_ptr.hbm [resolvable:$true] %s71_s30 }
   0xe   :  { %53 = dma.hbm_to_vmem [thread:$0]  %s46_s23, 768, %s48_s26, [#allocation6], %s651_s27, %s651_s27, %s652_s28  }
   0xf   :  { %s653_s10 = smov [#allocation10]   ;;  %s86_s13 = sshll.u32 %s748_s7, 4  ;;  %s87_s13 = int_to_ptr.hbm [resolvable:$true] %s86_s13 }
  0x10   :  { %s73_s11 = sshll.u32 %s653_s10, 4  ;;  %s654_s14 = smov [#allocation11]   ;;  %s74_s11 = int_to_ptr.vmem [resolvable:$true] %s73_s11 }
  0x11   :  { %79 = dma.hbm_to_vmem [thread:$0]  %s72_s30, 5120, %s74_s11, [#allocation9], %s651_s27, %s651_s27, %s652_s28  }
  0x12   :  { %s88_s15 = sshll.u32 %s654_s14, 4  ;;  %s655_s16 = smov 128   ;;  %s89_s15 = int_to_ptr.vmem [resolvable:$true] %s88_s15 }
  0x13   :  { %s656_s17 = smov 8  }
  0x14   :  { %94 = dma.hbm_to_vmem [thread:$0]  %s87_s13, 2560, %s89_s15, [#allocation12], %s655_s16, %s655_s16, %s656_s17  }
  0x15   :  { %637 = dma.done.wait [#allocation3], 32  }
  0x16   :  { %638 = vsyncadd [#allocation3], 4294967264 }
  0x17   :  { %639 = dma.done.wait [#allocation6], 800  }
  0x18   :  { %640 = vsyncadd [#allocation6], 4294966496 }
  0x19   :  { %641 = dma.done.wait [#allocation9], 5376  }
  0x1a   :  { %642 = vsyncadd [#allocation9], 4294961920 }
  0x1b   :  { %643 = dma.done.wait [#allocation12], 2560  }
  0x1c   :  { %644 = vsyncadd [#allocation12], 4294964736  ;;  %v127_v0 = vld [vmem:[#allocation7 + $0x28] sm:$0xff]  ;;  %v125_v1 = vld [vmem:[#allocation7 + $0x18] sm:$0xff]  ;;  %vm175_vm0 = vcmask 195584   ;;  %vm131_vm1 = vcmask 64512  }
  0x1d   :  { %v126_v2 = vld [vmem:[#allocation7 + $0x20] sm:$0xff]  ;;  %212 = vmatpush.msra.mxu3 %v127_v0  ;;  %v124_v3 = vld [vmem:[#allocation7 + $0x10] sm:$0xff]  ;;  %v123_v4 = vld [vmem:[#allocation7 + $0x8] sm:$0xff]  ;;  %vm275_vm2 = vcmask 261120   ;;  %s437_s23 = sshll.u32 %s750_s9, 4  ;;  %vm428_vm3 = vcmask 1016832   ;;  %s438_s23 = int_to_ptr.hbm [resolvable:$true] %s437_s23 }
  0x1e   :  { %192 = vmatpush.msra.mxu2 %v126_v2  ;;  %v122_v5 = vld [vmem:[#allocation7] sm:$0xff]  ;;  %v130_v6 = vld [vmem:[#allocation8 + $0x8] sm:$0xff]  ;;  %v129_v8 = vld [vmem:[#allocation8] sm:$0xff] }
  0x1f   :  { %213 = vmatpush.msra.mxu3 %v125_v1  ;;  %v121_v7 = vld [vmem:[#allocation2] sm:$0x3]  ;;  %170 = vmatpush.msra.mxu1 %v130_v6  ;;  %v128_v9 = vld [vmem:[#allocation5] sm:$0x3]  ;;  %v259_v10 = vld [vmem:[#allocation10 + $0xf0] sm:$0xff] }
  0x20   :  { %193 = vmatpush.msra.mxu2 %v124_v3  ;;  %150 = vmatpush.msra.mxu0 %v129_v8  ;;  %v260_v11 = vld [vmem:[#allocation10 + $0xf8] sm:$0xff]  ;;  %v257_v12 = vld [vmem:[#allocation10 + $0xe0] sm:$0xff]  ;;  %v258_v13 = vld [vmem:[#allocation10 + $0xe8] sm:$0xff] }
  0x21   :  { %214 = vmatpush.msra.mxu3 %v123_v4  ;;  %451 = vmatmul.msk.f32.vlgmr.msra.gmra.mxu1 %vm131_vm1, %v128_v9  ;;  %v255_v14 = vld [vmem:[#allocation10 + $0xd0] sm:$0xff]  ;;  %v256_v15 = vld [vmem:[#allocation10 + $0xd8] sm:$0xff]  ;;  %v253_v17 = vld [vmem:[#allocation10 + $0xc0] sm:$0xff] }
  0x22   :  { %194 = vmatpush.msra.mxu2 %v122_v5  ;;  %453 = vmatmul.msk.f32.vlgmr.msra.gmra.mxu3 %vm175_vm0, %v121_v7  ;;  %v267_v16 = vld [vmem:[#allocation10 + $0x130] sm:$0xff]  ;;  %v254_v18 = vld [vmem:[#allocation10 + $0xc8] sm:$0xff]  ;;  %v252_v20 = vld [vmem:[#allocation10 + $0xb8] sm:$0xff] }
  0x23   :  { %452 = vmatmul.msk.f32.vlgmr.msra.gmra.mxu2 %vm175_vm0, %v121_v7  ;;  %450 = vmatmul.msk.f32.vlgmr.msra.gmra.mxu0 %vm131_vm1, %v128_v9  ;;  %v251_v19 = vld [vmem:[#allocation10 + $0xb0] sm:$0xff]  ;;  %v249_v21 = vld [vmem:[#allocation10 + $0xa0] sm:$0xff]  ;;  %v250_v22 = vld [vmem:[#allocation10 + $0xa8] sm:$0xff] }
  0x24   :  { %279 = vmatpush.msrb.mxu0 %v259_v10  ;;  %319 = vmatpush.msrb.mxu2 %v260_v11  ;;  %v247_v23 = vld [vmem:[#allocation10 + $0x90] sm:$0xff]  ;;  %v248_v24 = vld [vmem:[#allocation10 + $0x98] sm:$0xff]  ;;  %v245_v25 = vld [vmem:[#allocation10 + $0x80] sm:$0xff] }
  0x25   :  { %311 = vmatpush.msrb.mxu3 %v267_v16  ;;  %v246_v26 = vld [vmem:[#allocation10 + $0x88] sm:$0xff]  ;;  %v243_v27 = vld [vmem:[#allocation10 + $0x70] sm:$0xff]  ;;  %v244_v28 = vld [vmem:[#allocation10 + $0x78] sm:$0xff] }
  0x26   :  { %280 = vmatpush.msrb.mxu0 %v257_v12  ;;  %320 = vmatpush.msrb.mxu2 %v258_v13  ;;  %v241_v29 = vld [vmem:[#allocation10 + $0x60] sm:$0xff]  ;;  %v239_v30 = vld [vmem:[#allocation10 + $0x50] sm:$0xff]  ;;  %v242_v31 = vld [vmem:[#allocation10 + $0x68] sm:$0xff] }
  0x27   :  { %v265_v32 = vld [vmem:[#allocation10 + $0x120] sm:$0xff]  ;;  %v240_v34 = vld [vmem:[#allocation10 + $0x58] sm:$0xff]  ;;  %v263_v35 = vld [vmem:[#allocation10 + $0x110] sm:$0xff] }
  0x28   :  { %281 = vmatpush.msrb.mxu0 %v255_v14  ;;  %321 = vmatpush.msrb.mxu2 %v256_v15  ;;  %v237_v33 = vld [vmem:[#allocation10 + $0x40] sm:$0xff]  ;;  %v235_v36 = vld [vmem:[#allocation10 + $0x30] sm:$0xff]  ;;  %v238_v37 = vld [vmem:[#allocation10 + $0x48] sm:$0xff] }
  0x29   :  { %312 = vmatpush.msrb.mxu3 %v265_v32  ;;  %v261_v38 = vld [vmem:[#allocation10 + $0x100] sm:$0xff]  ;;  %v236_v40 = vld [vmem:[#allocation10 + $0x38] sm:$0xff]  ;;  %v231_v42 = vld [vmem:[#allocation10 + $0x10] sm:$0xff] }
  0x2a   :  { %282 = vmatpush.msrb.mxu0 %v253_v17  ;;  %322 = vmatpush.msrb.mxu2 %v254_v18  ;;  %v233_v39 = vld [vmem:[#allocation10 + $0x20] sm:$0xff]  ;;  %v268_v41 = vld [vmem:[#allocation10 + $0x138] sm:$0xff]  ;;  %v234_v43 = vld [vmem:[#allocation10 + $0x28] sm:$0xff] }
  0x2b   :  { %313 = vmatpush.msrb.mxu3 %v263_v35  ;;  %v266_v44 = vld [vmem:[#allocation10 + $0x128] sm:$0xff]  ;;  %v229_v45 = vld [vmem:[#allocation10] sm:$0xff]  ;;  %v232_v46 = vld [vmem:[#allocation10 + $0x18] sm:$0xff] }
  0x2c   :  { %283 = vmatpush.msrb.mxu0 %v251_v19  ;;  %323 = vmatpush.msrb.mxu2 %v252_v20  ;;  %v264_v47 = vld [vmem:[#allocation10 + $0x118] sm:$0xff]  ;;  %v230_v48 = vld [vmem:[#allocation10 + $0x8] sm:$0xff]  ;;  %v375_v51 = vld [vmem:[#allocation11 + $0x70] sm:$0xff] }
  0x2d   :  { %314 = vmatpush.msrb.mxu3 %v261_v38  ;;  %v262_v49 = vld [vmem:[#allocation10 + $0x108] sm:$0xff]  ;;  %v376_v50 = vld [vmem:[#allocation11 + $0x78] sm:$0xff]  ;;  %v373_v53 = vld [vmem:[#allocation11 + $0x60] sm:$0xff] }
  0x2e   :  { %284 = vmatpush.msrb.mxu0 %v249_v21  ;;  %324 = vmatpush.msrb.mxu2 %v250_v22  ;;  %v374_v52 = vld [vmem:[#allocation11 + $0x68] sm:$0xff]  ;;  %v372_v54 = vld [vmem:[#allocation11 + $0x58] sm:$0xff]  ;;  %v371_v55 = vld [vmem:[#allocation11 + $0x50] sm:$0xff] }
  0x2f   :  { %351 = vmatpush.msra.mxu3 %v268_v41  ;;  %388 = vmatpush.msrb.mxu1 %v376_v50  ;;  %v370_v56 = vld [vmem:[#allocation11 + $0x48] sm:$0xff]  ;;  %v369_v57 = vld [vmem:[#allocation11 + $0x40] sm:$0xff]  ;;  %v219_v58 = vld [vmem:[%s745_s4] sm:$0x3] }
  0x30   :  { %285 = vmatpush.msrb.mxu0 %v247_v23  ;;  %325 = vmatpush.msrb.mxu2 %v248_v24  ;;  %v368_v59 = vld [vmem:[#allocation11 + $0x38] sm:$0xff]  ;;  %v222_v62 = vperm.slane %v219_v58, 1  ;;  %v221_v63 = vperm.slane %v219_v58, 0  ;;  %v367_v0 = vld [vmem:[#allocation11 + $0x30] sm:$0xff]  ;;  %v366_v5 = vld [vmem:[#allocation11 + $0x28] sm:$0xff] }
  0x31   :  { %352 = vmatpush.msra.mxu3 %v266_v44  ;;  %389 = vmatpush.msrb.mxu1 %v375_v51  ;;  %v365_v8 = vld [vmem:[#allocation11 + $0x20] sm:$0xff]  ;;  %v364_v11 = vld [vmem:[#allocation11 + $0x18] sm:$0xff]  ;;  %v363_v12 = vld [vmem:[#allocation11 + $0x10] sm:$0xff] }
  0x32   :  { %286 = vmatpush.msrb.mxu0 %v245_v25  ;;  %326 = vmatpush.msrb.mxu2 %v246_v26  ;;  %v362_v13 = vld [vmem:[#allocation11 + $0x8] sm:$0xff]  ;;  %v361_v14 = vld [vmem:[#allocation11] sm:$0xff]  ;;  %v380_v15 = vld [vmem:[#allocation11 + $0x98] sm:$0xff] }
  0x33   :  { %353 = vmatpush.msra.mxu3 %v264_v47  ;;  %390 = vmatpush.msrb.mxu1 %v374_v52  ;;  %v379_v16 = vld [vmem:[#allocation11 + $0x90] sm:$0xff]  ;;  %v378_v17 = vld [vmem:[#allocation11 + $0x88] sm:$0xff]  ;;  %v377_v18 = vld [vmem:[#allocation11 + $0x80] sm:$0xff] }
  0x34   :  { %287 = vmatpush.msrb.mxu0 %v243_v27  ;;  %327 = vmatpush.msrb.mxu2 %v244_v28  ;;  %v269_v19 = vld [vmem:[%s747_s6] sm:$0x3]  ;;  %s657_s6 = smov [#allocation13]  }
  0x35   :  { %354 = vmatpush.msra.mxu3 %v262_v49  ;;  %391 = vmatpush.msrb.mxu1 %v373_v53  ;;  %v271_v20 = vperm.slane %v269_v19, 0  ;;  %v272_v25 = vperm.slane %v269_v19, 1  ;;  %v468_v32 = vld [vmem:[%s749_s8] ss:$0 sm:$0xff]  ;;  %s435_s21 = sshll.u32 %s657_s6, 4  ;;  %s436_s21 = int_to_ptr.vmem [resolvable:$true] %s435_s21 }
  0x36   :  { %288 = vmatpush.msrb.mxu0 %v241_v29  ;;  %328 = vmatpush.msrb.mxu2 %v242_v31 }
  0x37   :  { %392 = vmatpush.msrb.mxu1 %v372_v54 }
  0x38   :  { %289 = vmatpush.msrb.mxu0 %v239_v30  ;;  %329 = vmatpush.msrb.mxu2 %v240_v34 }
  0x39   :  { %393 = vmatpush.msrb.mxu1 %v371_v55 }
  0x3a   :  { %290 = vmatpush.msrb.mxu0 %v237_v33  ;;  %330 = vmatpush.msrb.mxu2 %v238_v37 }
  0x3b   :  { %394 = vmatpush.msrb.mxu1 %v370_v56 }
  0x3c   :  { %291 = vmatpush.msrb.mxu0 %v235_v36  ;;  %331 = vmatpush.msrb.mxu2 %v236_v40 }
  0x3d   :  { %395 = vmatpush.msrb.mxu1 %v369_v57 }
  0x3e   :  { %292 = vmatpush.msrb.mxu0 %v233_v39  ;;  %332 = vmatpush.msrb.mxu2 %v234_v43 }
  0x3f   :  { %396 = vmatpush.msrb.mxu1 %v368_v59 }
  0x40   :  { %293 = vmatpush.msrb.mxu0 %v231_v42  ;;  %333 = vmatpush.msrb.mxu2 %v232_v46 }
  0x41   :  { %397 = vmatpush.msrb.mxu1 %v367_v0 }
  0x42   :  { %294 = vmatpush.msrb.mxu0 %v229_v45  ;;  %334 = vmatpush.msrb.mxu2 %v230_v48 }
  0x43   :  { %398 = vmatpush.msrb.mxu1 %v366_v5 }
  0x45   :  { %399 = vmatpush.msrb.mxu1 %v365_v8 }
  0x47   :  { %400 = vmatpush.msrb.mxu1 %v364_v11 }
  0x49   :  { %401 = vmatpush.msrb.mxu1 %v363_v12 }
  0x4b   :  { %402 = vmatpush.msrb.mxu1 %v362_v13 }
  0x4d   :  { %403 = vmatpush.msrb.mxu1 %v361_v14 }
  0x9e   :  { %v172_v60 = vpop.f32.mrf.mxu1 }
  0xa0   :  { %v152_v61 = vpop.f32.mrf.mxu0 }
  0xa5   :  { %v216_v1 = vpop.f32.mrf.mxu3 }
  0xa6   :  { %v196_v2 = vpop.f32.mrf.mxu2  ;;  %v217_v3 = vadd.f32 %v216_v1, %v172_v60 }
  0xa7   :  { %v197_v4 = vadd.f32 %v196_v2, %v152_v61 }
  0xa8   :  { %v226_v6 = vadd.f32 %v222_v62, %v217_v3 }
  0xa9   :  { %v225_v7 = vadd.f32 %v221_v63, %v197_v4 }
  0xaa   :  { %v228_v9 = vmax.f32 %v226_v6, 0.0 }
  0xab   :  { %v227_v10 = vmax.f32 %v225_v7, 0.0 }
  0xac   :  { %454 = vmatmul.msk.f32.vlgmr.msrb.gmra.mxu3 %vm275_vm2, %v228_v9 }
  0xad   :  { %295 = vmatmul.f32.vlgmr.msrb.gmra.mxu0 %v227_v10  ;;  %335 = vmatmul.f32.vlgmr.msrb.gmra.mxu2 %v227_v10 }
  0xae   :  { %420 = vmatpush.msrb.mxu3 %v380_v15 }
  0xb0   :  { %421 = vmatpush.msrb.mxu3 %v379_v16 }
  0xb2   :  { %422 = vmatpush.msrb.mxu3 %v378_v17 }
  0xb4   :  { %455 = vmatmul.msk.f32.vlgmr.msra.gmra.mxu3 %vm275_vm2, %v228_v9 }
  0xb5   :  { %423 = vmatpush.msrb.mxu3 %v377_v18 }
 0x12a   :  { %v296_v21 = vpop.f32.mrf.mxu0 }
 0x12b   :  { %v297_v22 = vadd.f32 %v296_v21, %v271_v20 }
 0x12f   :  { %v316_v23 = vpop.f32.mrf.mxu3 }
 0x130   :  { %v317_v24 = vadd.f32 %v316_v23, %v297_v22  ;;  %v336_v26 = vpop.f32.mrf.mxu2 }
 0x131   :  { %v337_v28 = vadd.f32 %v336_v26, %v272_v25 }
 0x132   :  { %v359_v27 = vmax.f32 %v317_v24, 0.0 }
 0x134   :  { %404 = vmatmul.f32.vlgmr.msrb.gmra.mxu1 %v359_v27 }
 0x137   :  { %v356_v29 = vpop.f32.mrf.mxu3 }
 0x138   :  { %v357_v30 = vadd.f32 %v356_v29, %v337_v28 }
 0x13a   :  { %v360_v31 = vmax.f32 %v357_v30, 0.0 }
 0x13c   :  { %456 = vmatmul.msk.f32.vlgmr.msrb.gmra.mxu3 %vm275_vm2, %v360_v31 }
 0x1b1   :  { %v405_v33 = vpop.f32.mrf.mxu1 }
 0x1b2   :  { %v406_v34 = vadd.f32 %v468_v32, %v405_v33 }
 0x1bf   :  { %v425_v35 = vpop.f32.mrf.mxu3 }
 0x1c0   :  { %v426_v36 = vadd.f32 %v425_v35, %v406_v34 }
 0x1c2   :  { %429 = vst.msk [vmem:[#allocation13] sm:$0x3] %vm428_vm3, %v426_v36 }
 0x1c3   :  { %440 = dma.vmem_to_hbm [thread:$0]  %s436_s21, 32, %s438_s23, [#allocation4]  }
 0x1c4   :  { %645 = dma.done.wait [#allocation4], 32  }
 0x1c5   :  { %646 = vsyncadd [#allocation4], 4294967264 }
 0x1c6   :  { %445 = vsyncpa [#allocation3], 1 }
 0x1c7   :  { %446 = vsyncpa [#allocation6], 1 }
 0x1c8   :  { %447 = vsyncpa [#allocation9], 1 }
 0x1c9   :  { %448 = vsyncpa [#allocation12], 1 }
 0x1ca   :  { %449 = vsyncpa [#allocation4], 1 }

</bundles_post_ra>
